<compile_context>
chip_gen: v5e
topology: v5e:2x2
jax: 0.10.0
libtpu: 0.0.40
codegen_flags: <defaults>
</compile_context>

<pallas_src>
import jax
import jax.numpy as jnp
import numpy as np
from jax.experimental import pallas as pl
from jax.experimental.pallas import tpu as pltpu

NEG_SLOPE = 0.01                      # nn.LeakyReLU default
BN_EPS = 1e-5                         # nn.BatchNorm2d default
VMEM_LIMIT_BYTES = 32 * 1024 * 1024   # safe on v5e/v6e (128 MiB) and v7x (64 MiB)


def _round_up(a, b):
    return (a + b - 1) // b * b


# ----------------------------------------------------------------------------- kernels
def conv_stats_kernel(w_ref, p_ref, y_ref, sum_ref, sumsq_ref):
    """One M-tile: y^T = W @ patches^T on the MXU + per-tile BN partial stats."""
    y = jnp.dot(w_ref[...], p_ref[...], preferred_element_type=jnp.float32)
    y_ref[...] = y                                       # (Cout, tile_m), lane-dense store
    sum_ref[...] = jnp.sum(y, axis=1, keepdims=True)     # (Cout, 1) partial sum
    sumsq_ref[...] = jnp.sum(y * y, axis=1, keepdims=True)


def bn_act_kernel(y_ref, scale_ref, shift_ref, out_ref):
    """One M-tile: folded BN affine (y*scale + shift) fused with LeakyReLU."""
    z = y_ref[...] * scale_ref[...] + shift_ref[...]     # (Cout,1) broadcast over lanes
    out_ref[...] = jnp.where(z >= 0, z, NEG_SLOPE * z)


# ----------------------------------------------------------------------------- wrapper
def _im2col_s2_k3_p1_T(x):
    """x: [N, Cin, H, W] -> patches^T [Cin*9, N*Ho*Wo] for k=3, stride=2, pad=1."""
    N, Cin, H, W = x.shape
    Ho, Wo = (H + 1) // 2, (W + 1) // 2
    xp = jnp.pad(x, ((0, 0), (0, 0), (1, 1), (1, 1)))
    cols = []
    for kh in range(3):
        for kw in range(3):
            cols.append(
                jax.lax.slice(
                    xp,
                    (0, 0, kh, kw),
                    (N, Cin, kh + 2 * (Ho - 1) + 1, kw + 2 * (Wo - 1) + 1),
                    (1, 1, 2, 2),
                )
            )                                            # each [N, Cin, Ho, Wo]
    p = jnp.stack(cols, axis=0)                          # [9, N, Cin, Ho, Wo]
    p = p.transpose(2, 0, 1, 3, 4)                       # [Cin, 9, N, Ho, Wo]
    return p.reshape(Cin * 9, N * Ho * Wo), Ho, Wo       # K ordered (Cin, kh, kw)


def down_conv(x, weight, bias, gamma, beta, *,
              compute_dtype=jnp.bfloat16, tile_m=2048):
    """Forward of DownConv.  x: [N, Cin, H, W] (NCHW), weight: [Cout, Cin, 3, 3].

    `bias` is accepted for API parity but mathematically cancels under
    training-mode BatchNorm (mean subtraction), so it is not applied.
    """
    del bias
    N, Cin, H, W = x.shape
    Cout = weight.shape[0]

    patches_t, Ho, Wo = _im2col_s2_k3_p1_T(x)
    K, M = patches_t.shape                               # K = Cin*9, M = N*Ho*Wo

    # M tiling (lane axis); tile must be a multiple of 128 lanes.
    tile_m = min(tile_m, _round_up(M, 128))
    num_tiles = pl.cdiv(M, tile_m)
    M_pad = num_tiles * tile_m

    patches_t = jnp.pad(patches_t, ((0, 0), (0, M_pad - M))).astype(compute_dtype)
    w2d = weight.reshape(Cout, K).astype(compute_dtype)  # [Cout, K], (Cin,kh,kw) order

    itemsize = jnp.dtype(compute_dtype).itemsize
    cparams = pltpu.CompilerParams(
        dimension_semantics=("parallel",),
        vmem_limit_bytes=VMEM_LIMIT_BYTES,
    )

    # -------- kernel 1: conv matmul + per-tile partial BN statistics --------
    cost1 = pl.CostEstimate(
        flops=2 * Cout * K * M_pad + 4 * Cout * M_pad,
        transcendentals=0,
        bytes_accessed=(K * M_pad * itemsize + Cout * K * itemsize
                        + Cout * M_pad * 4 + 2 * num_tiles * Cout * 4),
    )
    y_t, sums, sumsqs = pl.pallas_call(
        conv_stats_kernel,
        out_shape=(jax.ShapeDtypeStruct((Cout, M_pad), jnp.float32),
                   jax.ShapeDtypeStruct((num_tiles * Cout, 1), jnp.float32),
                   jax.ShapeDtypeStruct((num_tiles * Cout, 1), jnp.float32)),
        grid=(num_tiles,),
        in_specs=[
            pl.BlockSpec((Cout, K), lambda i: (0, 0)),          # weights, resident
            pl.BlockSpec((K, tile_m), lambda i: (0, i)),        # patches^T tile
        ],
        out_specs=(
            pl.BlockSpec((Cout, tile_m), lambda i: (0, i)),     # y^T tile (lane-dense)
            pl.BlockSpec((Cout, 1), lambda i: (i, 0)),          # partial sums
            pl.BlockSpec((Cout, 1), lambda i: (i, 0)),          # partial sums of squares
        ),
        compiler_params=cparams,
        cost_estimate=cost1,
    )(w2d, patches_t)

    # -------- tiny cross-tile reduction + folded BN affine (fp32, XLA) --------
    total_sum = sums.reshape(num_tiles, Cout).sum(axis=0)       # padded cols add exact 0
    total_sumsq = sumsqs.reshape(num_tiles, Cout).sum(axis=0)
    mean = total_sum / float(M)
    var = jnp.maximum(total_sumsq / float(M) - mean * mean, 0.0)
    scale = gamma.astype(jnp.float32) * jax.lax.rsqrt(var + BN_EPS)
    shift = beta.astype(jnp.float32) - mean * scale
    scale_c = scale[:, None]                                    # (Cout, 1)
    shift_c = shift[:, None]                                    # (Cout, 1)

    # -------- kernel 2: normalize (folded affine) + LeakyReLU --------
    cost2 = pl.CostEstimate(
        flops=3 * Cout * M_pad,
        transcendentals=0,
        bytes_accessed=2 * Cout * M_pad * 4 + 2 * Cout * 4,
    )
    out_t = pl.pallas_call(
        bn_act_kernel,
        out_shape=jax.ShapeDtypeStruct((Cout, M_pad), jnp.float32),
        grid=(num_tiles,),
        in_specs=[
            pl.BlockSpec((Cout, tile_m), lambda i: (0, i)),
            pl.BlockSpec((Cout, 1), lambda i: (0, 0)),
            pl.BlockSpec((Cout, 1), lambda i: (0, 0)),
        ],
        out_specs=pl.BlockSpec((Cout, tile_m), lambda i: (0, i)),
        compiler_params=cparams,
        cost_estimate=cost2,
    )(y_t, scale_c, shift_c)

    # [Cout, M] -> [Cout, N, Ho, Wo] -> NCHW
    return out_t[:, :M].reshape(Cout, N, Ho, Wo).transpose(1, 0, 2, 3)


def _reference(x, weight, bias, gamma, beta):
    """Pure-JAX reference of the PyTorch forward (for sanity checking)."""
    y = jax.lax.conv_general_dilated(
        x, weight, window_strides=(2, 2), padding=((1, 1), (1, 1)),
        dimension_numbers=("NCHW", "OIHW", "NCHW"),
    )
    y = y + bias[None, :, None, None]
    mean = y.mean(axis=(0, 2, 3), keepdims=True)
    var = ((y - mean) ** 2).mean(axis=(0, 2, 3), keepdims=True)
    y = (y - mean) / jnp.sqrt(var + BN_EPS)
    y = y * gamma[None, :, None, None] + beta[None, :, None, None]
    return jnp.where(y >= 0, y, NEG_SLOPE * y)


if __name__ == "__main__":
    key = jax.random.PRNGKey(0)
    k_x, k_w, k_b, k_g, k_be = jax.random.split(key, 5)

    N, Cin, H, W = 2, 4, 16, 16
    Cout = 8

    x = jax.random.normal(k_x, (N, Cin, H, W), dtype=jnp.float32)
    weight = jax.random.normal(k_w, (Cout, Cin, 3, 3), dtype=jnp.float32) * 0.1
    bias = jax.random.normal(k_b, (Cout,), dtype=jnp.float32) * 0.1
    gamma = 1.0 + 0.1 * jax.random.normal(k_g, (Cout,), dtype=jnp.float32)
    beta = 0.1 * jax.random.normal(k_be, (Cout,), dtype=jnp.float32)

    ref = jax.block_until_ready(_reference(x, weight, bias, gamma, beta))

    # fp32 path: tight tolerance check of the kernel structure.
    out_f32 = jax.block_until_ready(
        down_conv(x, weight, bias, gamma, beta, compute_dtype=jnp.float32))
    assert out_f32.shape == (N, Cout, (H + 1) // 2, (W + 1) // 2)
    assert np.allclose(np.asarray(out_f32), np.asarray(ref), atol=1e-4, rtol=1e-4)

    # bf16 MXU inputs / fp32 accumulation path (default, performance config).
    out_bf16 = jax.block_until_ready(
        down_conv(x, weight, bias, gamma, beta, compute_dtype=jnp.bfloat16))
    assert out_bf16.shape == (N, Cout, (H + 1) // 2, (W + 1) // 2)
    assert np.allclose(np.asarray(out_bf16), np.asarray(ref), atol=5e-2, rtol=5e-2)

    print("KERNEL_OK")
</pallas_src>

<mosaic_0001>
module attributes {stable_mosaic.version = 11 : i64} {
  func.func @conv_stats_kernel(%arg0: i32, %arg1: memref<8x36xf32, #tpu.memory_space<vmem>>, %arg2: memref<36x128xf32, #tpu.memory_space<vmem>>, %arg3: memref<8x128xf32, #tpu.memory_space<vmem>>, %arg4: memref<8x1xf32, #tpu.memory_space<vmem>>, %arg5: memref<8x1xf32, #tpu.memory_space<vmem>>) attributes {dimension_semantics = [#tpu.dimension_semantics<parallel>], iteration_bounds = array<i64: 1>, scalar_prefetch = 0 : i64, scratch_operands = 0 : i64, tpu.core_type = #tpu.core_type<tc>, window_params = [{pipeline_mode = #tpu.pipeline_mode<synchronous>, transform_indices = @transform_0, window_bounds = array<i64: 8, 36>}, {transform_indices = @transform_1, window_bounds = array<i64: 36, 128>}, {transform_indices = @transform_2, window_bounds = array<i64: 8, 128>}, {transform_indices = @transform_3, window_bounds = array<i64: 8, 1>}, {transform_indices = @transform_4, window_bounds = array<i64: 8, 1>}]} {
    %c0 = arith.constant 0 : index
    %c0_0 = arith.constant 0 : index
    %0 = vector.load %arg1[%c0, %c0_0] : memref<8x36xf32, #tpu.memory_space<vmem>>, vector<8x36xf32>
    %c0_1 = arith.constant 0 : index
    %c0_2 = arith.constant 0 : index
    %1 = vector.load %arg2[%c0_1, %c0_2] : memref<36x128xf32, #tpu.memory_space<vmem>>, vector<36x128xf32>
    %cst = arith.constant dense<0.000000e+00> : vector<8x128xf32>
    %2 = tpu.matmul %0, %1, %cst {dimension_numbers = #tpu.dot_dimension_numbers<[1], [0], [0], [1], [0, 0, 1, 1], [], []>} : vector<8x36xf32>, vector<36x128xf32>, vector<8x128xf32> -> vector<8x128xf32>
    %c0_3 = arith.constant 0 : index
    %c0_4 = arith.constant 0 : index
    %3 = vector.load %arg3[%c0_3, %c0_4] : memref<8x128xf32, #tpu.memory_space<vmem>>, vector<8x128xf32>
    tpu.vector_store %arg3[%c0_3, %c0_4], %2 {strides = array<i32>} : memref<8x128xf32, #tpu.memory_space<vmem>>, vector<8x128xf32>,
    %cst_5 = arith.constant dense<0.000000e+00> : vector<8xf32>
    %4 = vector.multi_reduction <add>, %2, %cst_5 [1] : vector<8x128xf32> to vector<8xf32>
    %5 = vector.shape_cast %4 : vector<8xf32> to vector<8x1xf32>
    %c0_6 = arith.constant 0 : index
    %c0_7 = arith.constant 0 : index
    %6 = vector.load %arg4[%c0_6, %c0_7] : memref<8x1xf32, #tpu.memory_space<vmem>>, vector<8x1xf32>
    tpu.vector_store %arg4[%c0_6, %c0_7], %5 {strides = array<i32>} : memref<8x1xf32, #tpu.memory_space<vmem>>, vector<8x1xf32>,
    %7 = arith.mulf %2, %2 : vector<8x128xf32>
    %cst_8 = arith.constant dense<0.000000e+00> : vector<8xf32>
    %8 = vector.multi_reduction <add>, %7, %cst_8 [1] : vector<8x128xf32> to vector<8xf32>
    %9 = vector.shape_cast %8 : vector<8xf32> to vector<8x1xf32>
    %c0_9 = arith.constant 0 : index
    %c0_10 = arith.constant 0 : index
    %10 = vector.load %arg5[%c0_9, %c0_10] : memref<8x1xf32, #tpu.memory_space<vmem>>, vector<8x1xf32>
    tpu.vector_store %arg5[%c0_9, %c0_10], %9 {strides = array<i32>} : memref<8x1xf32, #tpu.memory_space<vmem>>, vector<8x1xf32>,
    return
  }
  func.func @transform_0(%arg0: i32) -> (i32, i32) {
    %c0_i32 = arith.constant 0 : i32
    %c0_i32_0 = arith.constant 0 : i32
    %c0_i32_1 = arith.constant 0 : i32
    return %c0_i32, %c0_i32_0 : i32, i32
  }
  func.func @transform_1(%arg0: i32) -> (i32, i32) {
    %c0_i32 = arith.constant 0 : i32
    %c0_i32_0 = arith.constant 0 : i32
    return %c0_i32, %arg0 : i32, i32
  }
  func.func @transform_2(%arg0: i32) -> (i32, i32) {
    %c0_i32 = arith.constant 0 : i32
    %c0_i32_0 = arith.constant 0 : i32
    return %c0_i32, %arg0 : i32, i32
  }
  func.func @transform_3(%arg0: i32) -> (i32, i32) {
    %c0_i32 = arith.constant 0 : i32
    %c0_i32_0 = arith.constant 0 : i32
    return %arg0, %c0_i32 : i32, i32
  }
  func.func @transform_4(%arg0: i32) -> (i32, i32) {
    %c0_i32 = arith.constant 0 : i32
    %c0_i32_0 = arith.constant 0 : i32
    return %arg0, %c0_i32 : i32, i32
  }
}

</mosaic_0001>

<bundles_post_ra>
// kernel: tpu_custom_call.1
= control target key start
LH: loop header
LB: loop body
LE: loop exit
PB: predicated region body
PF: predicated region fallthrough
CT: control target
= control target key end

     0   :  { %10 = vsyncpa [#allocation3], 0  ;;  %s244_s0 = inlined_call_operand.hbm [shape: f32[8,36], index: 0, kind: input, shape index: {}]   ;;  %s245_s1 = inlined_call_operand.hbm [shape: f32[36,128], index: 1, kind: input, shape index: {}]   ;;  %s246_s2 = inlined_call_operand.hbm [shape: f32[8,128], index: 2, kind: output, shape index: {0}]   ;;  %s247_s3 = inlined_call_operand.vmem [shape: f32[8,1], index: 3, kind: output, shape index: {1}]   ;;  %s248_s4 = inlined_call_operand.vmem [shape: f32[8,1], index: 4, kind: output, shape index: {2}]  }
   0x1   :  { %11 = vsyncpa [#allocation6], 0 }
   0x2   :  { %12 = vsyncpa [#allocation4], 0  ;;  %s18_s17 = sshll.u32 %s244_s0, 4  ;;  %s199_s18 = smov [#allocation2]   ;;  %s19_s17 = int_to_ptr.hbm [resolvable:$true] %s18_s17 }
   0x3   :  { %s20_s19 = sshll.u32 %s199_s18, 4  ;;  %s28_s22 = sshll.u32 %s245_s1, 4  ;;  %s21_s19 = int_to_ptr.vmem [resolvable:$true] %s20_s19  ;;  %s29_s22 = int_to_ptr.hbm [resolvable:$true] %s28_s22 }
   0x4   :  { %23 = dma.hbm_to_vmem [thread:$0]  %s19_s17, 128, %s21_s19, [#allocation3]  }
   0x5   :  { %s200_s23 = smov [#allocation5]   ;;  %s201_s25 = smov 128  }
   0x6   :  { %s30_s24 = sshll.u32 %s200_s23, 4  ;;  %s202_s26 = smov 8   ;;  %s31_s24 = int_to_ptr.vmem [resolvable:$true] %s30_s24 }
   0x7   :  { %36 = dma.hbm_to_vmem [thread:$0]  %s29_s22, 640, %s31_s24, [#allocation6], %s201_s25, %s201_s25, %s202_s26  }
   0x8   :  { %193 = dma.done.wait [#allocation3], 128  }
   0x9   :  { %194 = vsyncadd [#allocation3], 4294967168 }
   0xa   :  { %195 = dma.done.wait [#allocation6], 640  }
   0xb   :  { %196 = vsyncadd [#allocation6], 4294966656  ;;  %vm55_vm0 = vcmask 1043456   ;;  %v50_v0 = vld [vmem:[#allocation5 + $0x20] sm:$0xf]  ;;  %v49_v1 = vld [vmem:[#allocation5 + $0x18] sm:$0xff] }
   0xc   :  { %114 = vmatpush.msk.msra.mxu0 %vm55_vm0, %v50_v0  ;;  %v48_v2 = vld [vmem:[#allocation5 + $0x10] sm:$0xff]  ;;  %v47_v3 = vld [vmem:[#allocation5 + $0x8] sm:$0xff]  ;;  %v46_v4 = vld [vmem:[#allocation5] sm:$0xff]  ;;  %vm51_vm1 = vcmask 293888   ;;  %s203_s0 = smov [#allocation7]   ;;  %s95_s29 = sshll.u32 %s246_s2, 4  ;;  %s96_s29 = int_to_ptr.hbm [resolvable:$true] %s95_s29 }
   0xd   :  { %v45_v5 = vld [vmem:[#allocation2] sm:$0xff]  ;;  %s93_s1 = sshll.u32 %s203_s0, 4  ;;  %vm82_vm2 = vcmask 7168   ;;  %s94_s1 = int_to_ptr.vmem [resolvable:$true] %s93_s1 }
   0xe   :  { %71 = vmatpush.msra.mxu0 %v49_v1 }
  0x10   :  { %72 = vmatpush.msra.mxu0 %v48_v2 }
  0x12   :  { %73 = vmatpush.msra.mxu0 %v47_v3 }
  0x14   :  { %74 = vmatpush.msra.mxu0 %v46_v4 }
  0x15   :  { %115 = vmatmul.msk.f32.vlgmr.msra.gmra.mxu0 %vm51_vm1, %v45_v5 }
  0x92   :  { %v76_v6 = vpop.f32.mrf.mxu0 }
  0x93   :  { %79 = vst [vmem:[#allocation7] sm:$0xff] %v76_v6  ;;  %80 = vadd.xlane.f32.xlu0 %v76_v6  ;;  %v84_v7 = vmul.f32 %v76_v6, %v76_v6 }
  0x94   :  { %98 = dma.vmem_to_hbm [thread:$0]  %s94_s1, 128, %s96_s29, [#allocation4]  }
  0x9b   :  { %85 = vadd.xlane.f32.xlu0 %v84_v7 }
 0x106   :  { %v81_v8 = vpop.xlane.xlu0 %80 }
 0x107   :  { %83 = vst.msk [vmem:[%s247_s3] sm:$0xff] %vm82_vm2, %v81_v8 }
 0x10e   :  { %v86_v9 = vpop.xlane.xlu0 %85 }
 0x10f   :  { %87 = vst.msk [vmem:[%s248_s4] sm:$0xff] %vm82_vm2, %v86_v9 }
 0x110   :  { %197 = dma.done.wait [#allocation4], 128  }
 0x111   :  { %198 = vsyncadd [#allocation4], 4294967168 }
 0x112   :  { %111 = vsyncpa [#allocation3], 1 }
 0x113   :  { %112 = vsyncpa [#allocation6], 1 }
 0x114   :  { %113 = vsyncpa [#allocation4], 1 }

</bundles_post_ra>
